<compile_context>
chip_gen: v5e
topology: v5e:2x2
jax: 0.10.0
libtpu: 0.0.40
codegen_flags: <defaults>
</compile_context>

<pallas_src>
import jax
import jax.numpy as jnp
from jax import lax
from jax.experimental import pallas as pl
from jax.experimental.pallas import tpu as pltpu

# ---------------- problem configuration (small, deterministic) --------------
DIM_Z = 8          # dim_z
DIM_INVSET = 4     # dim_invset  (<= dim_z)
H1, H2 = 32, 32    # dims_hidden_convexfun
EPS = 0.1          # eps
THRESHOLD = 1.0    # SReLU1 threshold
RADIUS = 1.0       # invariant-set ball radius ('vol' projection)


def _round_up(x, m):
    return ((x + m - 1) // m) * m


def _elu(x):
    return jnp.where(x > 0.0, x, jnp.exp(x) - 1.0)


def _srelu1(x, threshold):
    inv2t = 0.5 / threshold                       # fold /2/threshold into a constant
    half_t = 0.5 * threshold
    out = jnp.where(x <= 0.0, jnp.zeros_like(x), x)
    out = jnp.where(out < threshold, out * out * inv2t, out - half_t)
    return out


# ----------------------------- Pallas kernel --------------------------------
def candfun_kernel(zT_ref,          # (DIM_Z, TB)   batch on lanes
                   wx0T_ref,        # (H1, DIM_Z)
                   b0_ref,          # (H1, 1)
                   w1T_ref,         # (H2, H1 + DIM_Z)   fused [wz1; wx1]^T
                   b1_ref,          # (H2, 1)
                   wo_ref,          # (H2 + DIM_Z, 1)    fused [wzo; wxo]
                   bo_ref,          # (1, 1)
                   out_ref):        # (1, TB)       lane-dense output row
    zT = zT_ref[...]                                  # (DIM_Z, TB) f32
    tb = zT.shape[1]

    # --- invset.proj ('vol'): project first DIM_INVSET coords onto the unit
    #     ball; remaining coords of z_proj are zero (the torch.cat with zeros).
    row = lax.broadcasted_iota(jnp.int32, zT.shape, 0)
    inv_mask = (row < DIM_INVSET).astype(zT.dtype)
    z_inv = zT * inv_mask                             # (DIM_Z, TB)
    sqnorm = jnp.sum(z_inv * z_inv, axis=0, keepdims=True)     # (1, TB)
    scale = jnp.minimum(1.0, RADIUS * lax.rsqrt(sqnorm + 1e-12))
    z_projT = z_inv * scale                           # (DIM_Z, TB)

    # --- ICNN, evaluated ONCE on the lane-stacked [z | z_proj] batch.
    xT = jnp.concatenate([zT, z_projT], axis=1)       # (DIM_Z, 2*TB)

    h1 = _elu(jnp.dot(wx0T_ref[...], xT,
                      preferred_element_type=jnp.float32) + b0_ref[...])
    hx1 = jnp.concatenate([h1, xT], axis=0)           # (H1+DIM_Z, 2*TB)
    h2 = _elu(jnp.dot(w1T_ref[...], hx1,
                      preferred_element_type=jnp.float32) + b1_ref[...])
    hx2 = jnp.concatenate([h2, xT], axis=0)           # (H2+DIM_Z, 2*TB)

    # 1-wide output layer on the VPU (broadcast-mul + sublane reduce) instead
    # of an N=1 MXU matmul.
    y = jnp.sum(hx2 * wo_ref[...], axis=0, keepdims=True) + bo_ref[...]  # (1, 2*TB)

    value = y[:, :tb] - y[:, tb:]                     # icnn(z) - icnn(z_proj)

    # --- SReLU1 + eps * sum((z - z_proj)^2, dim=feature)
    diff = zT - z_projT
    quad = jnp.sum(diff * diff, axis=0, keepdims=True)          # (1, TB)
    out_ref[...] = _srelu1(value, THRESHOLD) + EPS * quad


# ------------------------------- wrapper -------------------------------------
def candfun_forward(z, params):
    """z: arbitrary leading shape with trailing dim DIM_Z.  Returns (B,)."""
    z_ = z.reshape(-1, DIM_Z).astype(jnp.float32)     # z.view(-1, dim_z)
    B = z_.shape[0]

    # ----- parameter prep (once, outside the kernel): softplus + fuse + T
    (wx0, b0, wz1_raw, wx1, b1, wzo_raw, wxo, bo) = params
    wz1 = jax.nn.softplus(wz1_raw)                    # ICNN non-negativity
    wzo = jax.nn.softplus(wzo_raw)
    wx0T = wx0.T                                      # (H1, DIM_Z)
    b0T = b0.T                                        # (H1, 1)
    w1T = jnp.concatenate([wz1, wx1], axis=0).T       # (H2, H1+DIM_Z)
    b1T = b1.T                                        # (H2, 1)
    wo_col = jnp.concatenate([wzo, wxo], axis=0)      # (H2+DIM_Z, 1)
    boT = bo.T                                        # (1, 1)

    # ----- batch tiling along lanes: pad B up to a multiple of the tile.
    TB = min(512, _round_up(B, 128))                  # lane-aligned tile
    B_pad = _round_up(B, TB)
    zT = jnp.zeros((DIM_Z, B_pad), jnp.float32).at[:, :B].set(z_.T)

    grid = (B_pad // TB,)
    const = lambda i: (0, 0)                          # weights resident across tiles

    out = pl.pallas_call(
        candfun_kernel,
        out_shape=jax.ShapeDtypeStruct((1, B_pad), jnp.float32),
        grid_spec=pltpu.PrefetchScalarGridSpec(
            num_scalar_prefetch=0,
            grid=grid,
            in_specs=[
                pl.BlockSpec((DIM_Z, TB), lambda i: (0, i)),       # z tile
                pl.BlockSpec((H1, DIM_Z), const),                  # wx0^T
                pl.BlockSpec((H1, 1), const),                      # b0^T
                pl.BlockSpec((H2, H1 + DIM_Z), const),             # fused w1^T
                pl.BlockSpec((H2, 1), const),                      # b1^T
                pl.BlockSpec((H2 + DIM_Z, 1), const),              # fused wo
                pl.BlockSpec((1, 1), const),                       # bo
            ],
            out_specs=pl.BlockSpec((1, TB), lambda i: (0, i)),
        ),
        compiler_params=pltpu.CompilerParams(
            dimension_semantics=("parallel",)),
    )(zT, wx0T, b0T, w1T, b1T, wo_col, boT)

    return out[0, :B]                                 # value.view(-1)


# ------------------------------ reference ------------------------------------
def candfun_reference(z, params):
    """Pure-JAX reference for validation (same math as the kernel)."""
    z_ = z.reshape(-1, DIM_Z).astype(jnp.float32)
    (wx0, b0, wz1_raw, wx1, b1, wzo_raw, wxo, bo) = params
    wz1 = jax.nn.softplus(wz1_raw)
    wzo = jax.nn.softplus(wzo_raw)

    z_inv = z_[:, :DIM_INVSET]
    sqnorm = jnp.sum(z_inv * z_inv, axis=1, keepdims=True)
    scale = jnp.minimum(1.0, RADIUS * lax.rsqrt(sqnorm + 1e-12))
    z_proj = jnp.concatenate(
        [z_inv * scale, jnp.zeros((z_.shape[0], DIM_Z - DIM_INVSET), jnp.float32)],
        axis=1)

    def icnn(x):
        h = _elu(x @ wx0 + b0)
        h = _elu(h @ wz1 + x @ wx1 + b1)
        return h @ wzo + x @ wxo + bo

    value = icnn(z_) - icnn(z_proj)
    quad = jnp.sum((z_ - z_proj) ** 2, axis=1, keepdims=True)
    return (_srelu1(value, THRESHOLD) + EPS * quad).reshape(-1)


def init_params(key):
    ks = jax.random.split(key, 8)
    s = 0.1
    wx0 = s * jax.random.normal(ks[0], (DIM_Z, H1), jnp.float32)
    b0 = s * jax.random.normal(ks[1], (1, H1), jnp.float32)
    wz1 = s * jax.random.normal(ks[2], (H1, H2), jnp.float32)
    wx1 = s * jax.random.normal(ks[3], (DIM_Z, H2), jnp.float32)
    b1 = s * jax.random.normal(ks[4], (1, H2), jnp.float32)
    wzo = s * jax.random.normal(ks[5], (H2, 1), jnp.float32)
    wxo = s * jax.random.normal(ks[6], (DIM_Z, 1), jnp.float32)
    bo = s * jax.random.normal(ks[7], (1, 1), jnp.float32)
    return (wx0, b0, wz1, wx1, b1, wzo, wxo, bo)


if __name__ == "__main__":
    key = jax.random.PRNGKey(0)
    k_param, k_z = jax.random.split(key)
    params = init_params(k_param)

    # Input: leading shape (2, 4) with trailing dim DIM_Z -> flattened B = 8.
    z = jax.random.normal(k_z, (2, 4, DIM_Z), jnp.float32)

    out = candfun_forward(z, params)
    out = jax.block_until_ready(out)

    ref = candfun_reference(z, params)
    assert out.shape == (8,)
    assert jnp.allclose(out, ref, rtol=1e-5, atol=1e-5), (out, ref)

    print("KERNEL_OK")
</pallas_src>

<mosaic_0001>
module attributes {stable_mosaic.version = 11 : i64} {
  func.func @candfun_kernel(%arg0: i32, %arg1: memref<8x128xf32, #tpu.memory_space<vmem>>, %arg2: memref<32x8xf32, #tpu.memory_space<vmem>>, %arg3: memref<32x1xf32, #tpu.memory_space<vmem>>, %arg4: memref<32x40xf32, #tpu.memory_space<vmem>>, %arg5: memref<32x1xf32, #tpu.memory_space<vmem>>, %arg6: memref<40x1xf32, #tpu.memory_space<vmem>>, %arg7: memref<1x1xf32, #tpu.memory_space<vmem>>, %arg8: memref<1x128xf32, #tpu.memory_space<vmem>>) attributes {dimension_semantics = [#tpu.dimension_semantics<parallel>], iteration_bounds = array<i64: 1>, scalar_prefetch = 0 : i64, scratch_operands = 0 : i64, tpu.core_type = #tpu.core_type<tc>, window_params = [{transform_indices = @transform_0, window_bounds = array<i64: 8, 128>}, {pipeline_mode = #tpu.pipeline_mode<synchronous>, transform_indices = @transform_1, window_bounds = array<i64: 32, 8>}, {pipeline_mode = #tpu.pipeline_mode<synchronous>, transform_indices = @transform_2, window_bounds = array<i64: 32, 1>}, {pipeline_mode = #tpu.pipeline_mode<synchronous>, transform_indices = @transform_3, window_bounds = array<i64: 32, 40>}, {pipeline_mode = #tpu.pipeline_mode<synchronous>, transform_indices = @transform_4, window_bounds = array<i64: 32, 1>}, {pipeline_mode = #tpu.pipeline_mode<synchronous>, transform_indices = @transform_5, window_bounds = array<i64: 40, 1>}, {pipeline_mode = #tpu.pipeline_mode<synchronous>, transform_indices = @transform_6, window_bounds = array<i64: 1, 1>}, {transform_indices = @transform_7, window_bounds = array<i64: 1, 128>}]} {
    %c0 = arith.constant 0 : index
    %c0_0 = arith.constant 0 : index
    %0 = vector.load %arg1[%c0, %c0_0] : memref<8x128xf32, #tpu.memory_space<vmem>>, vector<8x128xf32>
    %1 = tpu.iota {dimensions = array<i32: 0>} : vector<8x128xi32>
    %c4_i32 = arith.constant 4 : i32
    %2 = vector.broadcast %c4_i32 : i32 to vector<8x128xi32>
    %3 = arith.cmpi slt, %1, %2 : vector<8x128xi32>
    %4 = arith.extui %3 : vector<8x128xi1> to vector<8x128xi32>
    %5 = arith.sitofp %4 : vector<8x128xi32> to vector<8x128xf32>
    %6 = arith.mulf %0, %5 : vector<8x128xf32>
    %7 = arith.mulf %6, %6 : vector<8x128xf32>
    %cst = arith.constant dense<0.000000e+00> : vector<128xf32>
    %8 = vector.multi_reduction <add>, %7, %cst [0] : vector<8x128xf32> to vector<128xf32>
    %9 = vector.shape_cast %8 : vector<128xf32> to vector<1x128xf32>
    %cst_1 = arith.constant 9.99999996E-13 : f32
    %10 = vector.broadcast %cst_1 : f32 to vector<1x128xf32>
    %11 = arith.addf %9, %10 : vector<1x128xf32>
    %12 = math.rsqrt %11 : vector<1x128xf32>
    %cst_2 = arith.constant 1.000000e+00 : f32
    %13 = vector.broadcast %cst_2 : f32 to vector<1x128xf32>
    %14 = arith.mulf %13, %12 : vector<1x128xf32>
    %cst_3 = arith.constant 1.000000e+00 : f32
    %15 = vector.broadcast %cst_3 : f32 to vector<1x128xf32>
    %16 = arith.minimumf %15, %14 : vector<1x128xf32>
    %17 = vector.broadcast %16 : vector<1x128xf32> to vector<8x128xf32>
    %18 = arith.mulf %6, %17 : vector<8x128xf32>
    %19 = tpu.concatenate %0, %18 in 1 : vector<8x128xf32>, vector<8x128xf32> -> vector<8x256xf32>
    %c0_4 = arith.constant 0 : index
    %c0_5 = arith.constant 0 : index
    %20 = vector.load %arg2[%c0_4, %c0_5] : memref<32x8xf32, #tpu.memory_space<vmem>>, vector<32x8xf32>
    %cst_6 = arith.constant dense<0.000000e+00> : vector<32x256xf32>
    %21 = tpu.matmul %20, %19, %cst_6 {dimension_numbers = #tpu.dot_dimension_numbers<[1], [0], [0], [1], [0, 0, 1, 1], [], []>} : vector<32x8xf32>, vector<8x256xf32>, vector<32x256xf32> -> vector<32x256xf32>
    %c0_7 = arith.constant 0 : index
    %c0_8 = arith.constant 0 : index
    %22 = vector.load %arg3[%c0_7, %c0_8] : memref<32x1xf32, #tpu.memory_space<vmem>>, vector<32x1xf32>
    %23 = vector.broadcast %22 : vector<32x1xf32> to vector<32x256xf32>
    %24 = arith.addf %21, %23 : vector<32x256xf32>
    %cst_9 = arith.constant 0.000000e+00 : f32
    %25 = vector.broadcast %cst_9 : f32 to vector<32x256xf32>
    %26 = arith.cmpf ogt, %24, %25 : vector<32x256xf32>
    %27 = math.exp %24 : vector<32x256xf32>
    %cst_10 = arith.constant 1.000000e+00 : f32
    %28 = vector.broadcast %cst_10 : f32 to vector<32x256xf32>
    %29 = arith.subf %27, %28 : vector<32x256xf32>
    %30 = arith.select %26, %24, %29 : vector<32x256xi1>, vector<32x256xf32>
    %31 = tpu.concatenate %30, %19 in 0 : vector<32x256xf32>, vector<8x256xf32> -> vector<40x256xf32>
    %c0_11 = arith.constant 0 : index
    %c0_12 = arith.constant 0 : index
    %32 = vector.load %arg4[%c0_11, %c0_12] : memref<32x40xf32, #tpu.memory_space<vmem>>, vector<32x40xf32>
    %cst_13 = arith.constant dense<0.000000e+00> : vector<32x256xf32>
    %33 = tpu.matmul %32, %31, %cst_13 {dimension_numbers = #tpu.dot_dimension_numbers<[1], [0], [0], [1], [0, 0, 1, 1], [], []>} : vector<32x40xf32>, vector<40x256xf32>, vector<32x256xf32> -> vector<32x256xf32>
    %c0_14 = arith.constant 0 : index
    %c0_15 = arith.constant 0 : index
    %34 = vector.load %arg5[%c0_14, %c0_15] : memref<32x1xf32, #tpu.memory_space<vmem>>, vector<32x1xf32>
    %35 = vector.broadcast %34 : vector<32x1xf32> to vector<32x256xf32>
    %36 = arith.addf %33, %35 : vector<32x256xf32>
    %cst_16 = arith.constant 0.000000e+00 : f32
    %37 = vector.broadcast %cst_16 : f32 to vector<32x256xf32>
    %38 = arith.cmpf ogt, %36, %37 : vector<32x256xf32>
    %39 = math.exp %36 : vector<32x256xf32>
    %cst_17 = arith.constant 1.000000e+00 : f32
    %40 = vector.broadcast %cst_17 : f32 to vector<32x256xf32>
    %41 = arith.subf %39, %40 : vector<32x256xf32>
    %42 = arith.select %38, %36, %41 : vector<32x256xi1>, vector<32x256xf32>
    %43 = tpu.concatenate %42, %19 in 0 : vector<32x256xf32>, vector<8x256xf32> -> vector<40x256xf32>
    %c0_18 = arith.constant 0 : index
    %c0_19 = arith.constant 0 : index
    %44 = vector.load %arg6[%c0_18, %c0_19] : memref<40x1xf32, #tpu.memory_space<vmem>>, vector<40x1xf32>
    %45 = vector.broadcast %44 : vector<40x1xf32> to vector<40x256xf32>
    %46 = arith.mulf %43, %45 : vector<40x256xf32>
    %cst_20 = arith.constant dense<0.000000e+00> : vector<256xf32>
    %47 = vector.multi_reduction <add>, %46, %cst_20 [0] : vector<40x256xf32> to vector<256xf32>
    %48 = vector.shape_cast %47 : vector<256xf32> to vector<1x256xf32>
    %c0_21 = arith.constant 0 : index
    %c0_22 = arith.constant 0 : index
    %49 = vector.load %arg7[%c0_21, %c0_22] : memref<1x1xf32, #tpu.memory_space<vmem>>, vector<1x1xf32>
    %50 = vector.broadcast %49 : vector<1x1xf32> to vector<1x256xf32>
    %51 = arith.addf %48, %50 : vector<1x256xf32>
    %52 = vector.extract_strided_slice %51 {offsets = [0, 0], sizes = [1, 128], strides = [1, 1]} : vector<1x256xf32> to vector<1x128xf32>
    %53 = vector.extract_strided_slice %51 {offsets = [0, 128], sizes = [1, 128], strides = [1, 1]} : vector<1x256xf32> to vector<1x128xf32>
    %54 = arith.subf %52, %53 : vector<1x128xf32>
    %55 = arith.subf %0, %18 : vector<8x128xf32>
    %56 = arith.mulf %55, %55 : vector<8x128xf32>
    %cst_23 = arith.constant dense<0.000000e+00> : vector<128xf32>
    %57 = vector.multi_reduction <add>, %56, %cst_23 [0] : vector<8x128xf32> to vector<128xf32>
    %58 = vector.shape_cast %57 : vector<128xf32> to vector<1x128xf32>
    %cst_24 = arith.constant 0.000000e+00 : f32
    %59 = vector.broadcast %cst_24 : f32 to vector<1x128xf32>
    %60 = arith.cmpf ole, %54, %59 : vector<1x128xf32>
    %cst_25 = arith.constant 0.000000e+00 : f32
    %61 = vector.broadcast %cst_25 : f32 to vector<1x128xf32>
    %62 = arith.select %60, %61, %54 : vector<1x128xi1>, vector<1x128xf32>
    %cst_26 = arith.constant 1.000000e+00 : f32
    %63 = vector.broadcast %cst_26 : f32 to vector<1x128xf32>
    %64 = arith.cmpf olt, %62, %63 : vector<1x128xf32>
    %65 = arith.mulf %62, %62 : vector<1x128xf32>
    %cst_27 = arith.constant 5.000000e-01 : f32
    %66 = vector.broadcast %cst_27 : f32 to vector<1x128xf32>
    %67 = arith.mulf %65, %66 : vector<1x128xf32>
    %cst_28 = arith.constant 5.000000e-01 : f32
    %68 = vector.broadcast %cst_28 : f32 to vector<1x128xf32>
    %69 = arith.subf %62, %68 : vector<1x128xf32>
    %70 = arith.select %64, %67, %69 : vector<1x128xi1>, vector<1x128xf32>
    %cst_29 = arith.constant 1.000000e-01 : f32
    %71 = vector.broadcast %cst_29 : f32 to vector<1x128xf32>
    %72 = arith.mulf %71, %58 : vector<1x128xf32>
    %73 = arith.addf %70, %72 : vector<1x128xf32>
    %c0_30 = arith.constant 0 : index
    %c0_31 = arith.constant 0 : index
    %74 = vector.load %arg8[%c0_30, %c0_31] : memref<1x128xf32, #tpu.memory_space<vmem>>, vector<1x128xf32>
    tpu.vector_store %arg8[%c0_30, %c0_31], %73 {strides = array<i32>} : memref<1x128xf32, #tpu.memory_space<vmem>>, vector<1x128xf32>,
    return
  }
  func.func @transform_0(%arg0: i32) -> (i32, i32) {
    %c0_i32 = arith.constant 0 : i32
    %c0_i32_0 = arith.constant 0 : i32
    return %c0_i32, %arg0 : i32, i32
  }
  func.func @transform_1(%arg0: i32) -> (i32, i32) {
    %c0_i32 = arith.constant 0 : i32
    %c0_i32_0 = arith.constant 0 : i32
    %c0_i32_1 = arith.constant 0 : i32
    return %c0_i32, %c0_i32_0 : i32, i32
  }
  func.func @transform_2(%arg0: i32) -> (i32, i32) {
    %c0_i32 = arith.constant 0 : i32
    %c0_i32_0 = arith.constant 0 : i32
    %c0_i32_1 = arith.constant 0 : i32
    return %c0_i32, %c0_i32_0 : i32, i32
  }
  func.func @transform_3(%arg0: i32) -> (i32, i32) {
    %c0_i32 = arith.constant 0 : i32
    %c0_i32_0 = arith.constant 0 : i32
    %c0_i32_1 = arith.constant 0 : i32
    return %c0_i32, %c0_i32_0 : i32, i32
  }
  func.func @transform_4(%arg0: i32) -> (i32, i32) {
    %c0_i32 = arith.constant 0 : i32
    %c0_i32_0 = arith.constant 0 : i32
    %c0_i32_1 = arith.constant 0 : i32
    return %c0_i32, %c0_i32_0 : i32, i32
  }
  func.func @transform_5(%arg0: i32) -> (i32, i32) {
    %c0_i32 = arith.constant 0 : i32
    %c0_i32_0 = arith.constant 0 : i32
    %c0_i32_1 = arith.constant 0 : i32
    return %c0_i32, %c0_i32_0 : i32, i32
  }
  func.func @transform_6(%arg0: i32) -> (i32, i32) {
    %c0_i32 = arith.constant 0 : i32
    %c0_i32_0 = arith.constant 0 : i32
    %c0_i32_1 = arith.constant 0 : i32
    return %c0_i32, %c0_i32_0 : i32, i32
  }
  func.func @transform_7(%arg0: i32) -> (i32, i32) {
    %c0_i32 = arith.constant 0 : i32
    %c0_i32_0 = arith.constant 0 : i32
    return %c0_i32, %arg0 : i32, i32
  }
}

</mosaic_0001>

<bundles_post_ra>
// kernel: tpu_custom_call.1
= control target key start
LH: loop header
LB: loop body
LE: loop exit
PB: predicated region body
PF: predicated region fallthrough
CT: control target
= control target key end

     0   :  { %s686_s0 = inlined_call_operand.vmem [shape: f32[8,128], index: 0, kind: input, shape index: {}]   ;;  %s687_s1 = inlined_call_operand.vmem [shape: f32[32,8], index: 1, kind: input, shape index: {}]   ;;  %s688_s2 = inlined_call_operand.vmem [shape: f32[32,1], index: 2, kind: input, shape index: {}]   ;;  %s689_s3 = inlined_call_operand.vmem [shape: f32[32,40], index: 3, kind: input, shape index: {}]   ;;  %s690_s4 = inlined_call_operand.vmem [shape: f32[32,1], index: 4, kind: input, shape index: {}]   ;;  %s691_s5 = inlined_call_operand.vmem [shape: f32[40,1], index: 5, kind: input, shape index: {}]   ;;  %s692_s6 = inlined_call_operand.<no memory space> [shape: f32[1,1], index: 6, kind: input, shape index: {}]   ;;  %s693_s7 = inlined_call_operand.hbm [shape: f32[1,128], index: 7, kind: output, shape index: {}]  }
   0x1   :  { %v12_v0 = vstv %s692_s6 }
   0x2   :  { %13 = vst [vmem:[#allocation2] sm:$0x1] %v12_v0 }
   0x3   :  { %v587_v1 = vld [vmem:[%s686_s0] sm:$0xff]  ;;  %vm84_vm0 = vcmask 64512   ;;  %v30_v3 = vlaneseq  ;;  %v538_v4 = vmov 0   ;;  %v63_v5 = vld [vmem:[%s688_s2 + $0x18] sm:$0xff]  ;;  %v61_v6 = vld [vmem:[%s688_s2 + $0x8] sm:$0xff] }
   0x4   :  { %v592_v2 = vld [vmem:[%s687_s1] sm:$0xff]  ;;  %112 = vmatpush.msra.mxu0 %v587_v1  ;;  %475 = vset.pattern.permute.xlu0 %v538_v4 }
   0x5   :  { %439 = vmatmul.msk.f32.vlgmr.msra.gmra.mxu0 %vm84_vm0, %v592_v2  ;;  %81 = vperm.xlu0 %475, %v63_v5   ;;  %v31_v7 = vshrl.u32 %v30_v3, 7 }
   0x6   :  { %476 = vset.pattern.permute.xlu1 %v538_v4  ;;  %247 = vmatpush.msra.mxu2 %v587_v1 }
   0x7   :  { %14 = vsyncpa [#allocation4], 0  ;;  %71 = vperm.xlu1 %476, %v61_v6   ;;  %vm32_vm1 = vcmp.lt.s32.totalorder %v31_v7, 4  ;;  %477 = vset.pattern.permute.xlu2 %v538_v4  ;;  %v539_v8 = vmov 0.0   ;;  %v57_v11 = vld [vmem:[%s687_s1 + $0x8] sm:$0xff]  ;;  %v62_v12 = vld [vmem:[%s688_s2 + $0x10] sm:$0xff] }
   0x8   :  { %v438_v9 = vsel %vm32_vm1, 1.0, %v539_v8  ;;  %v60_v14 = vld [vmem:[%s688_s2] sm:$0xff]  ;;  %v58_v18 = vld [vmem:[%s687_s1 + $0x10] sm:$0xff]  ;;  %v59_v23 = vld [vmem:[%s687_s1 + $0x18] sm:$0xff]  ;;  %vm223_vm9 = vcmask 326656   ;;  %s429_s2 = sshll.u32 %s693_s7, 4  ;;  %s430_s2 = int_to_ptr.hbm [resolvable:$true] %s429_s2 }
   0x9   :  { %v35_v10 = vmul.f32 %v438_v9, %v587_v1  ;;  %v201_v24 = vld [vmem:[%s690_s4 + $0x10] sm:$0xff]  ;;  %v202_v27 = vld [vmem:[%s690_s4 + $0x18] sm:$0xff]  ;;  %v335_v28 = vld [vmem:[%s691_s5 + $0x8] sm:$0xff] }
   0xa   :  { %v336_v33 = vld [vmem:[%s691_s5 + $0x10] sm:$0xff]  ;;  %v338_v34 = vld [vmem:[%s691_s5 + $0x20] sm:$0xff]  ;;  %v196_v6 = vld [vmem:[%s689_s3 + $0x8] sm:$0xff] }
   0xb   :  { %v36_v13 = vmul.f32 %v35_v10, %v35_v10  ;;  %v394_v38 = vld [vmem:[#allocation2] sm:$0x1]  ;;  %v197_v9 = vld [vmem:[%s689_s3 + $0x10] sm:$0xff] }
   0xc   :  { %v195_v4 = vld [vmem:[%s689_s3] sm:$0xff] }
   0xd   :  { %440 = vmatmul.msk.f32.gmra.mxu0 %vm84_vm0, %v57_v11  ;;  %76 = vperm.xlu0 %475, %v62_v12   ;;  %v37_v15 = vrot.slane %v36_v13, 4  ;;  %v199_v8 = vld [vmem:[%s690_s4] sm:$0xff] }
   0xe   :  { %205 = vperm.xlu2 %477, %v199_v8  }
   0xf   :  { %66 = vperm.xlu1 %476, %v60_v14   ;;  %v38_v16 = vadd.f32 %v37_v15, %v36_v13  ;;  %v198_v14 = vld [vmem:[%s689_s3 + $0x18] sm:$0xff] }
  0x11   :  { %v39_v17 = vrot.slane %v38_v16, 2 }
  0x13   :  { %v40_v19 = vadd.f32 %v39_v17, %v38_v16 }
  0x15   :  { %441 = vmatmul.msk.f32.gmra.mxu0 %vm84_vm0, %v58_v18  ;;  %v41_v20 = vrot.slane %v40_v19, 1  ;;  %215 = vperm.xlu0 %475, %v201_v24  }
  0x17   :  { %v42_v21 = vadd.f32 %v41_v20, %v40_v19  ;;  %220 = vperm.xlu1 %476, %v202_v27  }
  0x19   :  { %v43_v22 = vadd.f32 1e-12, %v42_v21 }
  0x1b   :  { %478 = vrsqrt.f32 %v43_v22  ;;  %vm50_vm2 = vweird.f32 %v43_v22 }
  0x1d   :  { %442 = vmatmul.msk.f32.gmra.mxu0 %vm84_vm0, %v59_v23  ;;  %346 = vperm.xlu0 %475, %v335_v28  }
  0x1f   :  { %351 = vperm.xlu1 %476, %v336_v33  }
  0x21   :  { %v479_v25 = vpop.eup %478 }
  0x22   :  { %v45_v26 = vmul.f32 %v479_v25, %v43_v22  ;;  %vm51_vm3 = vweird.f32 %v479_v25  ;;  %v334_v22 = vld [vmem:[%s691_s5] sm:$0xff] }
  0x23   :  { %vm52_vm4 = vmor %vm50_vm2, %vm51_vm3 }
  0x24   :  { %v46_v29 = vmul.f32 %v479_v25, %v45_v26 }
  0x25   :  { %361 = vperm.xlu0 %475, %v338_v34  }
  0x26   :  { %v47_v30 = vmul.f32 0.5, %v46_v29 }
  0x27   :  { %397 = vperm.xlu1 %476, %v394_v38  }
  0x28   :  { %v48_v31 = vsub.f32 1.5, %v47_v30 }
  0x2a   :  { %v49_v32 = vmul.f32 %v479_v25, %v48_v31  ;;  %v337_v31 = vld [vmem:[%s691_s5 + $0x18] sm:$0xff]  ;;  %s540_s5 = smov [#allocation3]  }
  0x2b   :  { %s427_s16 = sshll.u32 %s540_s5, 4  ;;  %s428_s16 = int_to_ptr.vmem [resolvable:$true] %s427_s16 }
  0x2c   :  { %v53_v35 = vsel %vm52_vm4, %v479_v25, %v49_v32 }
  0x2d   :  { %v54_v36 = vmin.f32 %v53_v35, 1.0 }
  0x2f   :  { %v638_v37 = vmul.f32 %v54_v36, %v35_v10  ;;  %v200_v10 = vld [vmem:[%s690_s4 + $0x8] sm:$0xff] }
  0x30   :  { %210 = vperm.xlu2 %477, %v200_v10  }
  0x31   :  { %141 = vmatpush.msra.mxu1 %v638_v37  ;;  %276 = vmatpush.msra.mxu3 %v638_v37 }
  0x32   :  { %443 = vmatmul.msk.f32.vlgmr.msra.gmra.mxu1 %vm84_vm0, %v592_v2 }
  0x38   :  { %341 = vperm.xlu2 %477, %v334_v22  }
  0x3a   :  { %444 = vmatmul.msk.f32.gmra.mxu1 %vm84_vm0, %v57_v11 }
  0x40   :  { %356 = vperm.xlu2 %477, %v337_v31  }
  0x42   :  { %445 = vmatmul.msk.f32.gmra.mxu1 %vm84_vm0, %v58_v18 }
  0x4a   :  { %446 = vmatmul.msk.f32.gmra.mxu1 %vm84_vm0, %v59_v23 }
  0x77   :  { %v82_v40 = vpop.permute.xlu0 %81 }
  0x79   :  { %v72_v41 = vpop.permute.xlu1 %71 }
  0x7f   :  { %v77_v43 = vpop.permute.xlu0 %76 }
  0x81   :  { %v67_v46 = vpop.permute.xlu1 %66 }
  0x82   :  { %v114_v39 = vpop.f32.mrf.mxu0 }
  0x83   :  { %v115_v48 = vadd.f32 %v114_v39, %v67_v46  ;;  %v206_v39 = vpop.permute.xlu2 %205 }
  0x85   :  { %v163_v52 = vmul.f32 1.442695, %v115_v48  ;;  %vm155_vm8 = vcmp.gt.f32.partialorder %v115_v48, 0.0 }
  0x8a   :  { %v117_v42 = vpop.f32.mrf.mxu0 }
  0x8b   :  { %v118_v47 = vadd.f32 %v117_v42, %v72_v41 }
  0x8d   :  { %v167_v50 = vmul.f32 1.442695, %v118_v47  ;;  %vm157_vm7 = vcmp.gt.f32.partialorder %v118_v47, 0.0 }
  0x92   :  { %v120_v44 = vpop.f32.mrf.mxu0 }
  0x93   :  { %v121_v45 = vadd.f32 %v120_v44, %v77_v43  ;;  %v216_v44 = vpop.permute.xlu0 %215 }
  0x95   :  { %v171_v49 = vmul.f32 1.442695, %v121_v45  ;;  %vm159_vm6 = vcmp.gt.f32.partialorder %v121_v45, 0.0 }
  0x97   :  { %480 = vpow2.f32 %v171_v49 }
  0x98   :  { %482 = vpow2.f32 %v167_v50 }
  0x99   :  { %484 = vpow2.f32 %v163_v52 }
  0x9a   :  { %v123_v51 = vpop.f32.mrf.mxu0 }
  0x9b   :  { %v124_v53 = vadd.f32 %v123_v51, %v82_v40 }
  0x9d   :  { %v175_v54 = vmul.f32 1.442695, %v124_v53  ;;  %v481_v55 = vpop.eup %480  ;;  %vm161_vm5 = vcmp.gt.f32.partialorder %v124_v53, 0.0 }
  0x9e   :  { %v483_v56 = vpop.eup %482  ;;  %v451_v58 = vadd.f32 -1.0, %v481_v55 }
  0x9f   :  { %486 = vpow2.f32 %v175_v54  ;;  %v485_v57 = vpop.eup %484  ;;  %v449_v61 = vadd.f32 -1.0, %v483_v56 }
  0xa0   :  { %v191_v63 = vsel %vm159_vm6, %v121_v45, %v451_v58  ;;  %v447_v0 = vadd.f32 -1.0, %v485_v57 }
  0xa1   :  { %v189_v2 = vsel %vm157_vm7, %v118_v47, %v449_v61  ;;  %v221_v47 = vpop.permute.xlu1 %220 }
  0xa2   :  { %v187_v3 = vsel %vm155_vm8, %v115_v48, %v447_v0 }
  0xa5   :  { %v487_v59 = vpop.eup %486 }
  0xa6   :  { %v453_v60 = vadd.f32 -1.0, %v487_v59 }
  0xa8   :  { %v193_v62 = vsel %vm161_vm5, %v124_v53, %v453_v60 }
  0xa9   :  { %248 = vmatpush.msra.mxu2 %v193_v62 }
  0xab   :  { %249 = vmatpush.msra.mxu2 %v191_v63 }
  0xad   :  { %250 = vmatpush.msra.mxu2 %v189_v2 }
  0xaf   :  { %v143_v5 = vpop.f32.mrf.mxu1  ;;  %251 = vmatpush.msra.mxu2 %v187_v3 }
  0xb0   :  { %455 = vmatmul.msk.f32.vlgmr.msra.gmra.mxu2 %vm223_vm9, %v195_v4  ;;  %v144_v15 = vadd.f32 %v143_v5, %v67_v46 }
  0xb2   :  { %v165_v20 = vmul.f32 1.442695, %v144_v15  ;;  %vm156_vm13 = vcmp.gt.f32.partialorder %v144_v15, 0.0 }
  0xb7   :  { %v146_v7 = vpop.f32.mrf.mxu1 }
  0xb8   :  { %456 = vmatmul.msk.f32.gmra.mxu2 %vm223_vm9, %v196_v6  ;;  %v147_v13 = vadd.f32 %v146_v7, %v72_v41  ;;  %v211_v41 = vpop.permute.xlu2 %210 }
  0xba   :  { %v169_v17 = vmul.f32 1.442695, %v147_v13  ;;  %vm158_vm12 = vcmp.gt.f32.partialorder %v147_v13, 0.0 }
  0xbf   :  { %v149_v11 = vpop.f32.mrf.mxu1 }
  0xc0   :  { %457 = vmatmul.msk.f32.gmra.mxu2 %vm223_vm9, %v197_v9  ;;  %v150_v12 = vadd.f32 %v149_v11, %v77_v43  ;;  %v342_v61 = vpop.permute.xlu2 %341 }
  0xc2   :  { %v173_v16 = vmul.f32 1.442695, %v150_v12  ;;  %vm160_vm11 = vcmp.gt.f32.partialorder %v150_v12, 0.0 }
  0xc4   :  { %488 = vpow2.f32 %v173_v16 }
  0xc5   :  { %490 = vpow2.f32 %v169_v17 }
  0xc7   :  { %v152_v18 = vpop.f32.mrf.mxu1 }
  0xc8   :  { %v153_v19 = vadd.f32 %v152_v18, %v82_v40  ;;  %458 = vmatmul.msk.f32.gmra.mxu2 %vm223_vm9, %v198_v14 }
  0xca   :  { %v177_v21 = vmul.f32 1.442695, %v153_v19  ;;  %v489_v23 = vpop.eup %488  ;;  %vm162_vm10 = vcmp.gt.f32.partialorder %v153_v19, 0.0 }
  0xcb   :  { %v491_v24 = vpop.eup %490  ;;  %v452_v27 = vadd.f32 -1.0, %v489_v23 }
  0xcc   :  { %492 = vpow2.f32 %v177_v21  ;;  %v450_v30 = vadd.f32 -1.0, %v491_v24 }
  0xcd   :  { %494 = vpow2.f32 %v165_v20  ;;  %v192_v32 = vsel %vm160_vm11, %v150_v12, %v452_v27 }
  0xce   :  { %v190_v34 = vsel %vm158_vm12, %v147_v13, %v450_v30  ;;  %v352_v13 = vpop.permute.xlu1 %351 }
  0xd2   :  { %v493_v25 = vpop.eup %492 }
  0xd3   :  { %v454_v26 = vadd.f32 -1.0, %v493_v25  ;;  %v495_v28 = vpop.eup %494 }
  0xd4   :  { %v448_v33 = vadd.f32 -1.0, %v495_v28 }
  0xd5   :  { %v194_v29 = vsel %vm162_vm10, %v153_v19, %v454_v26 }
  0xd6   :  { %277 = vmatpush.msra.mxu3 %v194_v29  ;;  %v188_v35 = vsel %vm156_vm13, %v144_v15, %v448_v33 }
  0xd8   :  { %278 = vmatpush.msra.mxu3 %v192_v32 }
  0xda   :  { %279 = vmatpush.msra.mxu3 %v190_v34 }
  0xdc   :  { %280 = vmatpush.msra.mxu3 %v188_v35 }
  0xdd   :  { %459 = vmatmul.msk.f32.vlgmr.msra.gmra.mxu3 %vm223_vm9, %v195_v4  ;;  %v347_v4 = vpop.permute.xlu0 %346 }
  0xe5   :  { %460 = vmatmul.msk.f32.gmra.mxu3 %vm223_vm9, %v196_v6  ;;  %v362_v22 = vpop.permute.xlu0 %361 }
  0xe6   :  { %v372_v29 = vmul.f32 %v362_v22, %v587_v1 }
  0xed   :  { %461 = vmatmul.msk.f32.gmra.mxu3 %vm223_vm9, %v197_v9 }
  0xf5   :  { %462 = vmatmul.msk.f32.gmra.mxu3 %vm223_vm9, %v198_v14  ;;  %v357_v14 = vpop.permute.xlu2 %356 }
 0x133   :  { %v253_v36 = vpop.f32.mrf.mxu2 }
 0x134   :  { %v254_v42 = vadd.f32 %v253_v36, %v206_v39 }
 0x136   :  { %v302_v48 = vmul.f32 1.442695, %v254_v42  ;;  %vm294_vm14 = vcmp.gt.f32.partialorder %v254_v42, 0.0 }
 0x138   :  { %496 = vpow2.f32 %v302_v48 }
 0x13b   :  { %v256_v38 = vpop.f32.mrf.mxu2 }
 0x13c   :  { %v257_v43 = vadd.f32 %v256_v38, %v211_v41  ;;  %v404_v38 = vsub.f32 %v587_v1, %v638_v37 }
 0x13e   :  { %v306_v49 = vmul.f32 1.442695, %v257_v43  ;;  %v497_v54 = vpop.eup %496  ;;  %vm296_vm15 = vcmp.gt.f32.partialorder %v257_v43, 0.0 }
 0x13f   :  { %v463_v58 = vadd.f32 -1.0, %v497_v54 }
 0x140   :  { %498 = vpow2.f32 %v306_v49 }
 0x141   :  { %v326_v2 = vsel %vm294_vm14, %v254_v42, %v463_v58 }
 0x142   :  { %v364_v9 = vmul.f32 %v342_v61, %v326_v2 }
 0x143   :  { %v259_v40 = vpop.f32.mrf.mxu2 }
 0x144   :  { %v260_v46 = vadd.f32 %v259_v40, %v216_v44 }
 0x146   :  { %v310_v51 = vmul.f32 1.442695, %v260_v46  ;;  %v499_v55 = vpop.eup %498  ;;  %vm298_vm0 = vcmp.gt.f32.partialorder %v260_v46, 0.0 }
 0x147   :  { %v465_v60 = vadd.f32 -1.0, %v499_v55 }
 0x148   :  { %500 = vpow2.f32 %v310_v51 }
 0x149   :  { %v328_v5 = vsel %vm296_vm15, %v257_v43, %v465_v60 }
 0x14a   :  { %v366_v11 = vmul.f32 %v347_v4, %v328_v5 }
 0x14b   :  { %v262_v45 = vpop.f32.mrf.mxu2 }
 0x14c   :  { %v263_v50 = vadd.f32 %v262_v45, %v221_v47  ;;  %v374_v18 = vadd.f32 %v366_v11, %v364_v9  ;;  %v405_v45 = vmul.f32 %v404_v38, %v404_v38 }
 0x14e   :  { %v314_v53 = vmul.f32 1.442695, %v263_v50  ;;  %v501_v57 = vpop.eup %500  ;;  %vm300_vm1 = vcmp.gt.f32.partialorder %v263_v50, 0.0  ;;  %v406_v51 = vrot.slane %v405_v45, 4 }
 0x14f   :  { %v467_v0 = vadd.f32 -1.0, %v501_v57 }
 0x150   :  { %502 = vpow2.f32 %v314_v53  ;;  %v407_v1 = vadd.f32 %v406_v51, %v405_v45 }
 0x151   :  { %v330_v8 = vsel %vm298_vm0, %v260_v46, %v467_v0 }
 0x152   :  { %v368_v16 = vmul.f32 %v352_v13, %v330_v8 }
 0x154   :  { %v375_v21 = vadd.f32 %v374_v18, %v368_v16 }
 0x156   :  { %v503_v62 = vpop.eup %502 }
 0x157   :  { %v469_v6 = vadd.f32 -1.0, %v503_v62 }
 0x159   :  { %v332_v15 = vsel %vm300_vm1, %v263_v50, %v469_v6 }
 0x15a   :  { %v370_v19 = vmul.f32 %v357_v14, %v332_v15 }
 0x15c   :  { %v376_v25 = vadd.f32 %v375_v21, %v370_v19 }
 0x15e   :  { %v377_v33 = vadd.f32 %v376_v25, %v372_v29 }
 0x160   :  { %v282_v52 = vpop.f32.mrf.mxu3 }
 0x161   :  { %v283_v63 = vadd.f32 %v282_v52, %v206_v39  ;;  %v378_v39 = vrot.slane %v377_v33, 4  ;;  %v373_v52 = vmul.f32 %v362_v22, %v638_v37 }
 0x163   :  { %v304_v7 = vmul.f32 1.442695, %v283_v63  ;;  %vm295_vm3 = vcmp.gt.f32.partialorder %v283_v63, 0.0  ;;  %v379_v46 = vadd.f32 %v378_v39, %v377_v33 }
 0x165   :  { %v380_v53 = vrot.slane %v379_v46, 2 }
 0x168   :  { %v285_v56 = vpop.f32.mrf.mxu3 }
 0x169   :  { %v286_v59 = vadd.f32 %v285_v56, %v211_v41  ;;  %v381_v56 = vadd.f32 %v380_v53, %v379_v46 }
 0x16b   :  { %v308_v3 = vmul.f32 1.442695, %v286_v59  ;;  %vm297_vm2 = vcmp.gt.f32.partialorder %v286_v59, 0.0  ;;  %v382_v60 = vrot.slane %v381_v56, 1 }
 0x16d   :  { %504 = vpow2.f32 %v308_v3  ;;  %v383_v2 = vadd.f32 %v382_v60, %v381_v56 }
 0x16e   :  { %506 = vpow2.f32 %v304_v7 }
 0x170   :  { %v288_v10 = vpop.f32.mrf.mxu3 }
 0x171   :  { %v289_v12 = vadd.f32 %v288_v10, %v216_v44 }
 0x173   :  { %v312_v17 = vmul.f32 1.442695, %v289_v12  ;;  %v505_v20 = vpop.eup %504  ;;  %vm299_vm4 = vcmp.gt.f32.partialorder %v289_v12, 0.0 }
 0x174   :  { %v507_v24 = vpop.eup %506  ;;  %v466_v27 = vadd.f32 -1.0, %v505_v20 }
 0x175   :  { %508 = vpow2.f32 %v312_v17  ;;  %v464_v31 = vadd.f32 -1.0, %v507_v24 }
 0x176   :  { %v329_v34 = vsel %vm297_vm2, %v286_v59, %v466_v27  ;;  %v408_v59 = vrot.slane %v407_v1, 2 }
 0x177   :  { %v327_v35 = vsel %vm295_vm3, %v283_v63, %v464_v31  ;;  %v367_v40 = vmul.f32 %v347_v4, %v329_v34  ;;  %v398_v63 = vpop.permute.xlu1 %397 }
 0x178   :  { %v291_v23 = vpop.f32.mrf.mxu3  ;;  %v365_v42 = vmul.f32 %v342_v61, %v327_v35  ;;  %v409_v0 = vadd.f32 %v408_v59, %v407_v1  ;;  %v400_v4 = vperm.slane %v398_v63, 0 }
 0x179   :  { %v292_v26 = vadd.f32 %v291_v23, %v221_v47 }
 0x17a   :  { %v384_v47 = vadd.f32 %v367_v40, %v365_v42  ;;  %v410_v6 = vrot.slane %v409_v0, 1  ;;  %v401_v7 = vadd.f32 %v400_v4, %v383_v2 }
 0x17b   :  { %v509_v28 = vpop.eup %508  ;;  %v316_v30 = vmul.f32 1.442695, %v292_v26  ;;  %vm301_vm5 = vcmp.gt.f32.partialorder %v292_v26, 0.0 }
 0x17c   :  { %v468_v32 = vadd.f32 -1.0, %v509_v28  ;;  %v411_v9 = vadd.f32 %v410_v6, %v409_v0 }
 0x17d   :  { %510 = vpow2.f32 %v316_v30 }
 0x17e   :  { %v331_v36 = vsel %vm299_vm4, %v289_v12, %v468_v32  ;;  %v419_v12 = vmul.f32 0.1, %v411_v9 }
 0x17f   :  { %v369_v43 = vmul.f32 %v352_v13, %v331_v36 }
 0x181   :  { %v385_v49 = vadd.f32 %v384_v47, %v369_v43 }
 0x183   :  { %v511_v41 = vpop.eup %510 }
 0x184   :  { %v470_v44 = vadd.f32 -1.0, %v511_v41 }
 0x186   :  { %v333_v48 = vsel %vm301_vm5, %v292_v26, %v470_v44 }
 0x187   :  { %v371_v50 = vmul.f32 %v357_v14, %v333_v48 }
 0x189   :  { %v386_v54 = vadd.f32 %v385_v49, %v371_v50 }
 0x18b   :  { %v387_v55 = vadd.f32 %v386_v54, %v373_v52 }
 0x18d   :  { %v388_v57 = vrot.slane %v387_v55, 4 }
 0x18f   :  { %v389_v58 = vadd.f32 %v388_v57, %v387_v55 }
 0x191   :  { %v390_v61 = vrot.slane %v389_v58, 2 }
 0x193   :  { %v391_v62 = vadd.f32 %v390_v61, %v389_v58 }
 0x195   :  { %v392_v3 = vrot.slane %v391_v62, 1 }
 0x197   :  { %v393_v5 = vadd.f32 %v392_v3, %v391_v62 }
 0x199   :  { %v402_v37 = vadd.f32 %v400_v4, %v393_v5 }
 0x19b   :  { %v403_v8 = vsub.f32 %v401_v7, %v402_v37 }
 0x19d   :  { %vm412_vm6 = vcmp.le.f32.partialorder %v403_v8, 0.0 }
 0x19e   :  { %v413_v10 = vsel %vm412_vm6, 0.0, %v403_v8 }
 0x19f   :  { %v415_v11 = vmul.f32 %v413_v10, %v413_v10  ;;  %v471_v14 = vadd.f32 -0.5, %v413_v10  ;;  %vm414_vm7 = vcmp.lt.f32.partialorder %v413_v10, 1.0 }
 0x1a1   :  { %v416_v13 = vmul.f32 0.5, %v415_v11 }
 0x1a3   :  { %v418_v15 = vsel %vm414_vm7, %v416_v13, %v471_v14 }
 0x1a4   :  { %v420_v16 = vadd.f32 %v419_v12, %v418_v15 }
 0x1a6   :  { %421 = vst [vmem:[#allocation3] sm:$0x1] %v420_v16 }
 0x1a7   :  { %432 = dma.vmem_to_hbm [thread:$0]  %s428_s16, 16, %s430_s2, [#allocation4]  }
 0x1a8   :  { %536 = dma.done.wait [#allocation4], 16  }
 0x1a9   :  { %537 = vsyncadd [#allocation4], 4294967280 }
 0x1aa   :  { %437 = vsyncpa [#allocation4], 1 }

</bundles_post_ra>
